<compile_context>
chip_gen: v5e
topology: v5e:2x2
jax: 0.10.0
libtpu: 0.0.40
codegen_flags: <defaults>
</compile_context>

<pallas_src>
import math

import jax
import jax.numpy as jnp
from jax.experimental import pallas as pl
from jax.experimental.pallas import tpu as pltpu


def _tan_kernel(x_ref, o_ref):
    # Upcast to f32 for the transcendental chain (no-op for f32 inputs).
    x = x_ref[...].astype(jnp.float32)
    # tan(x) = sin(x) / cos(x): sin/cos go to the EUP, the divide stays on the VPU.
    o_ref[...] = (jnp.sin(x) / jnp.cos(x)).astype(o_ref.dtype)


_LANE_CANDIDATES = (1024, 512, 256, 128)
# 512 rows x 1024 lanes f32 = 2 MiB per block; double-buffered input + output
# = 8 MiB of VMEM, under every chip's default scoped-VMEM limit (v5e: 16 MiB).
_MAX_ROW_TILE = 512


def _pick_row_tile(rows: int) -> int:
    """Row tile: big enough to amortize per-step overhead, small enough that the
    grid has >=3-4 programs (pipelining + both v7x TensorCores) when possible."""
    if rows < 32:
        return rows  # single block; block extent == full array extent is legal
    tile = -(-rows // 4)            # cdiv(rows, 4) -> aim for >=3-4 grid steps
    tile = ((tile + 7) // 8) * 8    # sublane alignment
    return min(tile, _MAX_ROW_TILE)


def _tan_2d(x2: jax.Array, out_dtype) -> jax.Array:
    """Run the tan kernel over a lane-dense (rows, lane) view."""
    rows, lane = x2.shape
    row_tile = _pick_row_tile(rows)
    grid = (pl.cdiv(rows, row_tile),)
    n = rows * lane
    itemsize = jnp.dtype(out_dtype).itemsize

    return pl.pallas_call(
        _tan_kernel,
        out_shape=jax.ShapeDtypeStruct((rows, lane), out_dtype),
        grid_spec=pltpu.PrefetchScalarGridSpec(
            num_scalar_prefetch=0,
            grid=grid,
            in_specs=[pl.BlockSpec((row_tile, lane), lambda i: (i, 0))],
            out_specs=pl.BlockSpec((row_tile, lane), lambda i: (i, 0)),
        ),
        compiler_params=pltpu.CompilerParams(
            dimension_semantics=("parallel",),
        ),
        cost_estimate=pl.CostEstimate(
            flops=n,
            transcendentals=2 * n,
            bytes_accessed=2 * n * itemsize,
        ),
    )(x2)


def tan_layer(x: jax.Array) -> jax.Array:
    """Elementwise tan of x (any shape), computed in a Pallas TPU kernel."""
    orig_shape = x.shape
    orig_dtype = x.dtype

    n = math.prod(orig_shape) if orig_shape else 1
    if n == 0:
        return x

    flat = x.reshape(-1)

    # Pick the widest lane-dense column width that divides the element count.
    lane = None
    for cand in _LANE_CANDIDATES:
        if n % cand == 0:
            lane = cand
            break

    if lane is not None:
        out2 = _tan_2d(flat.reshape(n // lane, lane), orig_dtype)
        return out2.reshape(orig_shape)

    # Unaligned fallback (n % 128 != 0): kernel on the 128-aligned prefix,
    # tiny (<128-element) tail in plain JAX. No full-array pad/slice passes.
    lane = 128
    main = n - (n % lane)
    parts = []
    if main:
        main_out = _tan_2d(flat[:main].reshape(main // lane, lane), orig_dtype)
        parts.append(main_out.reshape(-1))
    tail = flat[main:]
    parts.append(jnp.tan(tail.astype(jnp.float32)).astype(orig_dtype))
    out = jnp.concatenate(parts) if len(parts) > 1 else parts[0]
    return out.reshape(orig_shape)


if __name__ == "__main__":
    key = jax.random.PRNGKey(0)

    # Primary small shape consistent with the module (batch, window, features).
    B, T, F = 2, 8, 32
    # Keep values away from tan poles (pi/2 + k*pi) for a stable numeric check.
    x = jax.random.uniform(key, (B, T, F), dtype=jnp.float32, minval=-1.2, maxval=1.2)
    y = jax.block_until_ready(tan_layer(x))
    assert y.shape == x.shape and y.dtype == x.dtype
    assert jnp.allclose(y, jnp.tan(x), atol=1e-5, rtol=1e-5)

    # bf16 path (f32 compute inside the kernel, bf16 store).
    xb = x.astype(jnp.bfloat16)
    yb = jax.block_until_ready(tan_layer(xb))
    assert yb.dtype == jnp.bfloat16 and yb.shape == x.shape
    assert jnp.allclose(yb.astype(jnp.float32), jnp.tan(xb.astype(jnp.float32)),
                        atol=2e-2, rtol=2e-2)

    # Larger aligned tensor: exercises the multi-program grid (pipelining path).
    k2, k3 = jax.random.split(jax.random.PRNGKey(0))
    x_big = jax.random.uniform(k2, (4, 128, 256), dtype=jnp.float32,
                               minval=-1.2, maxval=1.2)
    y_big = jax.block_until_ready(tan_layer(x_big))
    assert jnp.allclose(y_big, jnp.tan(x_big), atol=1e-5, rtol=1e-5)

    # Unaligned size: exercises the aligned-prefix + tail path (no pad/slice).
    x_odd = jax.random.uniform(k3, (3, 5, 7), dtype=jnp.float32,
                               minval=-1.2, maxval=1.2)
    y_odd = jax.block_until_ready(tan_layer(x_odd))
    assert y_odd.shape == x_odd.shape
    assert jnp.allclose(y_odd, jnp.tan(x_odd), atol=1e-5, rtol=1e-5)

    print("KERNEL_OK")
</pallas_src>

<mosaic_0001>
module attributes {stable_mosaic.version = 11 : i64} {
  func.func @_tan_kernel(%arg0: i32, %arg1: memref<1x512xf32, #tpu.memory_space<vmem>>, %arg2: memref<1x512xf32, #tpu.memory_space<vmem>>) attributes {dimension_semantics = [#tpu.dimension_semantics<parallel>], iteration_bounds = array<i64: 1>, scalar_prefetch = 0 : i64, scratch_operands = 0 : i64, tpu.core_type = #tpu.core_type<tc>, window_params = [{transform_indices = @transform_0, window_bounds = array<i64: 1, 512>}, {transform_indices = @transform_1, window_bounds = array<i64: 1, 512>}]} {
    %c0 = arith.constant 0 : index
    %c0_0 = arith.constant 0 : index
    %0 = vector.load %arg1[%c0, %c0_0] : memref<1x512xf32, #tpu.memory_space<vmem>>, vector<1x512xf32>
    %1 = math.sin %0 : vector<1x512xf32>
    %2 = math.cos %0 : vector<1x512xf32>
    %3 = arith.divf %1, %2 : vector<1x512xf32>
    %c0_1 = arith.constant 0 : index
    %c0_2 = arith.constant 0 : index
    %4 = vector.load %arg2[%c0_1, %c0_2] : memref<1x512xf32, #tpu.memory_space<vmem>>, vector<1x512xf32>
    tpu.vector_store %arg2[%c0_1, %c0_2], %3 {strides = array<i32>} : memref<1x512xf32, #tpu.memory_space<vmem>>, vector<1x512xf32>,
    return
  }
  func.func @transform_0(%arg0: i32) -> (i32, i32) {
    %c0_i32 = arith.constant 0 : i32
    %c0_i32_0 = arith.constant 0 : i32
    return %arg0, %c0_i32 : i32, i32
  }
  func.func @transform_1(%arg0: i32) -> (i32, i32) {
    %c0_i32 = arith.constant 0 : i32
    %c0_i32_0 = arith.constant 0 : i32
    return %arg0, %c0_i32 : i32, i32
  }
}

</mosaic_0001>

<bundles_post_ra>
// kernel: tpu_custom_call.1
= control target key start
LH: loop header
LB: loop body
LE: loop exit
PB: predicated region body
PF: predicated region fallthrough
CT: control target
= control target key end

     0   :  { %6 = vsyncpa [#allocation3], 0  ;;  %s514_s0 = inlined_call_operand.hbm [shape: f32[1,512], index: 0, kind: input, shape index: {}]   ;;  %s515_s1 = inlined_call_operand.hbm [shape: f32[1,512], index: 1, kind: output, shape index: {}]  }
   0x1   :  { %7 = vsyncpa [#allocation4], 0  ;;  %s13_s8 = sshll.u32 %s514_s0, 4  ;;  %s439_s9 = smov [#allocation2]   ;;  %s14_s8 = int_to_ptr.hbm [resolvable:$true] %s13_s8 }
   0x2   :  { %s15_s10 = sshll.u32 %s439_s9, 4  ;;  %s16_s10 = int_to_ptr.vmem [resolvable:$true] %s15_s10 }
   0x3   :  { %18 = dma.hbm_to_vmem [thread:$0]  %s14_s8, 64, %s16_s10, [#allocation3]  }
   0x4   :  { %435 = dma.done.wait [#allocation3], 64  }
   0x5   :  { %436 = vsyncadd [#allocation3], 4294967232  ;;  %v461_v0 = vld [vmem:[#allocation2] sm:$0xf]  ;;  %v440_v12 = vmov 683565275  }
   0x6   :  { %v27_v1 = vand.u32 2139095040, %v461_v0  ;;  %v24_v3 = vand.u32 2147483647, %v461_v0  ;;  %v441_v14 = vmov 2475754826   ;;  %vm26_vm12 = vcmp.lt.s32.totalorder %v461_v0, 0 }
   0x7   :  { %v442_v16 = vmov 2131351028   ;;  %v443_v18 = vmov 2102212464   ;;  %v444_v20 = vmov 920167782  }
   0x8   :  { %v28_v2 = vshrl.u32 %v27_v1, 23  ;;  %v31_v6 = vand.u32 8388607, %v24_v3  ;;  %v445_v26 = vmov 1326507024   ;;  %v446_v1 = vmov 0  }
   0x9   :  { %vm25_vm13 = vcmp.le.f32.partialorder %v24_v3, 0.7853982  ;;  %s447_s0 = smov [#allocation5]   ;;  %s360_s14 = sshll.u32 %s515_s1, 4  ;;  %s361_s14 = int_to_ptr.hbm [resolvable:$true] %s360_s14 }
   0xa   :  { %v370_v4 = vadd.s32 4294967169, %v28_v2  ;;  %v32_v9 = vor.u32 8388608, %v31_v6  ;;  %s358_s11 = sshll.u32 %s447_s0, 4  ;;  %s359_s11 = int_to_ptr.vmem [resolvable:$true] %s358_s11 }
   0xc   :  { %v34_v5 = vadd.s32 1, %v370_v4  ;;  %v470_v28 = vshll.u32 %v32_v9, 8 }
   0xe   :  { %vm35_vm0 = vcmp.gt.s32.totalorder %v34_v5, 0  ;;  %v73_v40 = vand.u32 65535, %v470_v28  ;;  %v74_v41 = vshrl.u32 %v470_v28, 16 }
   0xf   :  { %v36_v7 = vsel %vm35_vm0, %v34_v5, 0 }
  0x10   :  { %v38_v8 = vand.u32 31, %v36_v7  ;;  %v467_v10 = vshrl.u32 %v36_v7, 5 }
  0x12   :  { %v39_v11 = vsub.s32 32, %v38_v8  ;;  %v41_v13 = vshll.u32 %v440_v12, %v38_v8  ;;  %v44_v15 = vshll.u32 %v441_v14, %v38_v8  ;;  %v47_v17 = vshll.u32 %v442_v16, %v38_v8 }
  0x13   :  { %v50_v19 = vshll.u32 %v443_v18, %v38_v8  ;;  %v53_v21 = vshll.u32 %v444_v20, %v38_v8  ;;  %vm56_vm1 = vcmp.lt.s32.totalorder %v467_v10, 1  ;;  %vm59_vm2 = vcmp.lt.s32.totalorder %v467_v10, 4 }
  0x14   :  { %v42_v22 = vshrl.u32 %v441_v14, %v39_v11  ;;  %v45_v23 = vshrl.u32 %v442_v16, %v39_v11  ;;  %v48_v24 = vshrl.u32 %v443_v18, %v39_v11  ;;  %v51_v25 = vshrl.u32 %v444_v20, %v39_v11 }
  0x15   :  { %v54_v27 = vshrl.u32 %v445_v26, %v39_v11  ;;  %vm58_vm3 = vcmp.lt.s32.totalorder %v467_v10, 3  ;;  %vm57_vm4 = vcmp.lt.s32.totalorder %v467_v10, 2  ;;  %v40_v48 = vshrl.u32 %v440_v12, %v39_v11 }
  0x16   :  { %v43_v29 = vor.u32 %v42_v22, %v41_v13  ;;  %v46_v30 = vor.u32 %v45_v23, %v44_v15  ;;  %v49_v31 = vor.u32 %v48_v24, %v47_v17  ;;  %v52_v32 = vor.u32 %v51_v25, %v50_v19 }
  0x17   :  { %v55_v33 = vor.u32 %v54_v27, %v53_v21 }
  0x18   :  { %v64_v34 = vsel %vm56_vm1, %v43_v29, %v46_v30  ;;  %v68_v35 = vsel %vm56_vm1, %v46_v30, %v49_v31  ;;  %v65_v36 = vsel %vm59_vm2, %v52_v32, 920167782  ;;  %v60_v61 = vsel %vm56_vm1, %v40_v48, %v43_v29 }
  0x19   :  { %v69_v37 = vsel %vm59_vm2, %v55_v33, 1326507024  ;;  %v66_v38 = vsel %vm58_vm3, %v49_v31, %v65_v36  ;;  %v61_v63 = vsel %vm59_vm2, %v49_v31, 2102212464  ;;  %vm167_vm1 = vweird.f32 %v461_v0 }
  0x1a   :  { %v70_v39 = vsel %vm58_vm3, %v52_v32, %v69_v37  ;;  %v67_v42 = vsel %vm57_vm4, %v64_v34, %v66_v38  ;;  %v62_v12 = vsel %vm58_vm3, %v46_v30, %v61_v63 }
  0x1b   :  { %v71_v43 = vsel %vm57_vm4, %v68_v35, %v70_v39  ;;  %v97_v46 = vand.u32 65535, %v67_v42  ;;  %v98_v47 = vshrl.u32 %v67_v42, 16  ;;  %v63_v20 = vsel %vm57_vm4, %v60_v61, %v62_v12 }
  0x1c   :  { %v75_v44 = vand.u32 65535, %v71_v43  ;;  %v76_v45 = vshrl.u32 %v71_v43, 16  ;;  %v117_v24 = vmul.u32 %v470_v28, %v63_v20 }
  0x1d   :  { %v99_v52 = vmul.u32 %v97_v46, %v73_v40  ;;  %v100_v53 = vmul.u32 %v98_v47, %v73_v40  ;;  %v101_v54 = vmul.u32 %v97_v46, %v74_v41  ;;  %v102_v58 = vmul.u32 %v98_v47, %v74_v41 }
  0x1e   :  { %v77_v49 = vmul.u32 %v75_v44, %v73_v40  ;;  %v78_v50 = vmul.u32 %v76_v45, %v73_v40  ;;  %v79_v51 = vmul.u32 %v75_v44, %v74_v41  ;;  %v80_v55 = vmul.u32 %v76_v45, %v74_v41 }
  0x1f   :  { %v103_v59 = vshll.u32 %v100_v53, 16  ;;  %v105_v60 = vshll.u32 %v101_v54, 16  ;;  %v104_v9 = vshrl.u32 %v100_v53, 16  ;;  %v106_v16 = vshrl.u32 %v101_v54, 16 }
  0x20   :  { %v81_v56 = vshll.u32 %v78_v50, 16  ;;  %v83_v57 = vshll.u32 %v79_v51, 16  ;;  %v82_v5 = vshrl.u32 %v78_v50, 16  ;;  %v84_v13 = vshrl.u32 %v79_v51, 16 }
  0x21   :  { %vm107_vm6 = vc.u32 %v99_v52, %v103_v59  ;;  %v109_v4 = vadd.s32 %v103_v59, %v99_v52 }
  0x22   :  { %vm85_vm5 = vc.u32 %v77_v49, %v81_v56  ;;  %v87_v62 = vadd.s32 %v81_v56, %v77_v49  ;;  %v108_v7 = vsel %vm107_vm6, 1, %v446_v1 }
  0x23   :  { %v86_v2 = vsel %vm85_vm5, 1, %v446_v1  ;;  %v110_v11 = vadd.s32 %v108_v7, %v102_v58  ;;  %vm111_vm8 = vc.u32 %v109_v4, %v105_v60  ;;  %v113_v19 = vadd.s32 %v109_v4, %v105_v60 }
  0x24   :  { %v88_v6 = vadd.s32 %v86_v2, %v80_v55  ;;  %vm89_vm7 = vc.u32 %v87_v62, %v83_v57  ;;  %v112_v15 = vsel %vm111_vm8, 1, %v446_v1 }
  0x25   :  { %v90_v8 = vsel %vm89_vm7, 1, %v446_v1  ;;  %v114_v17 = vadd.s32 %v112_v15, %v110_v11 }
  0x26   :  { %v92_v14 = vadd.s32 %v90_v8, %v88_v6 }
  0x27   :  { %v115_v21 = vadd.s32 %v114_v17, %v104_v9 }
  0x28   :  { %v93_v18 = vadd.s32 %v92_v14, %v82_v5 }
  0x29   :  { %v116_v23 = vadd.s32 %v115_v21, %v106_v16 }
  0x2a   :  { %v94_v22 = vadd.s32 %v93_v18, %v84_v13 }
  0x2b   :  { %v120_v25 = vadd.s32 1, %v116_v23 }
  0x2c   :  { %vm119_vm9 = vc.u32 %v94_v22, %v113_v19  ;;  %v118_v10 = vadd.s32 %v113_v19, %v94_v22 }
  0x2d   :  { %v121_v26 = vsel %vm119_vm9, %v120_v25, %v116_v23  ;;  %v348_v25 = vlaneseq }
  0x2e   :  { %v122_v27 = vadd.s32 %v121_v26, %v117_v24 }
  0x2f   :  { %vm350_vm9 = vcmp.lt.s32.totalorder %v348_v25, 512 }
  0x30   :  { %v123_v29 = vadd.s32 536870912, %v122_v27 }
  0x32   :  { %v124_v30 = vshrl.u32 %v123_v29, 30 }
  0x34   :  { %v125_v31 = vshll.u32 %v124_v30, 30  ;;  %v148_v50 = vsub.s32 4, %v124_v30 }
  0x36   :  { %v126_v32 = vsub.s32 %v122_v27, %v125_v31  ;;  %v149_v55 = vsel %vm26_vm12, %v148_v50, %v124_v30 }
  0x37   :  { %v151_v58 = vsel %vm25_vm13, 0, %v149_v55 }
  0x38   :  { %vm127_vm10 = vcmp.lt.s32.totalorder %v126_v32, 0  ;;  %v128_v33 = vsub.s32 0, %v126_v32  ;;  %v323_v63 = vand.u32 3, %v151_v58  ;;  %v168_v9 = vadd.s32 3, %v151_v58 }
  0x3a   :  { %v129_v34 = vsel %vm127_vm10, %v128_v33, %v126_v32  ;;  %vm328_vm14 = vcmp.eq.s32.totalorder %v323_v63, 2  ;;  %vm325_vm15 = vcmp.eq.s32.totalorder %v323_v63, 0  ;;  %vm324_vm0 = vcmp.lt.s32.totalorder %v323_v63, 2 }
  0x3b   :  { %v130_v35 = vclz %v129_v34  ;;  %v169_v14 = vand.u32 3, %v168_v9 }
  0x3d   :  { %v371_v36 = vadd.s32 4294967294, %v130_v35  ;;  %vm171_vm2 = vcmp.eq.s32.totalorder %v169_v14, 0  ;;  %vm174_vm3 = vcmp.eq.s32.totalorder %v169_v14, 2  ;;  %vm170_vm4 = vcmp.lt.s32.totalorder %v169_v14, 2 }
  0x3f   :  { %vm372_vm11 = vcmp.lt.s32.totalorder %v371_v36, 0 }
  0x40   :  { %v133_v37 = vsel %vm372_vm11, 0, %v371_v36 }
  0x41   :  { %v134_v38 = vsub.s32 32, %v133_v37  ;;  %v135_v39 = vshll.u32 %v126_v32, %v133_v37  ;;  %v138_v40 = vsub.s32 4294967266, %v133_v37 }
  0x43   :  { %v136_v28 = vshrl.u32 %v118_v10, %v134_v38  ;;  %v139_v41 = vadd.s32 127, %v138_v40 }
  0x45   :  { %v137_v42 = vor.u32 %v136_v28, %v135_v39  ;;  %v140_v43 = vshll.u32 %v139_v41, 23 }
  0x47   :  { %v141_v44 = vor.u32 4788187, %v140_v43  ;;  %v144_v45 = vcvt.s32.f32 %v137_v42 }
  0x49   :  { %v142_v46 = vand.u32 2147483647, %v141_v44 }
  0x4b   :  { %v145_v47 = vmul.f32 %v144_v45, %v142_v46 }
  0x4d   :  { %v146_v48 = vxor.u32 2147483648, %v145_v47 }
  0x4f   :  { %v147_v49 = vsel %vm26_vm12, %v146_v48, %v145_v47 }
  0x50   :  { %v150_v51 = vsel %vm25_vm13, %v461_v0, %v147_v49 }
  0x51   :  { %v152_v52 = vmul.f32 %v150_v51, %v150_v51 }
  0x53   :  { %v153_v53 = vmul.f32 -0.001358992, %v152_v52  ;;  %v160_v54 = vmul.f32 -0.00019511016, %v152_v52 }
  0x55   :  { %v154_v56 = vadd.f32 0.041655596, %v153_v53  ;;  %v161_v57 = vadd.f32 0.008332121, %v160_v54 }
  0x57   :  { %v155_v59 = vmul.f32 %v154_v56, %v152_v52  ;;  %v162_v60 = vmul.f32 %v161_v57, %v152_v52 }
  0x59   :  { %v156_v61 = vadd.f32 -0.4999988, %v155_v59  ;;  %v163_v62 = vadd.f32 -0.16666654, %v162_v60 }
  0x5b   :  { %v157_v1 = vmul.f32 %v156_v61, %v152_v52  ;;  %v164_v2 = vmul.f32 %v163_v62, %v152_v52 }
  0x5d   :  { %v158_v3 = vadd.f32 1.0, %v157_v1  ;;  %v165_v4 = vadd.f32 1.0, %v164_v2 }
  0x5f   :  { %v166_v5 = vmul.f32 %v165_v4, %v150_v51  ;;  %v175_v6 = vxor.u32 2147483648, %v158_v3 }
  0x61   :  { %v172_v7 = vxor.u32 2147483648, %v166_v5  ;;  %v330_v8 = vsel %vm328_vm14, %v175_v6, %v166_v5  ;;  %v176_v18 = vsel %vm174_vm3, %v175_v6, %v166_v5 }
  0x63   :  { %v327_v11 = vsel %vm325_vm15, %v158_v3, %v172_v7  ;;  %v173_v17 = vsel %vm171_vm2, %v158_v3, %v172_v7 }
  0x64   :  { %v331_v12 = vsel %vm324_vm0, %v327_v11, %v330_v8  ;;  %v177_v22 = vsel %vm170_vm4, %v173_v17, %v176_v18 }
  0x65   :  { %v332_v13 = vsel %vm167_vm1, nan, %v331_v12  ;;  %v178_v27 = vsel %vm167_vm1, nan, %v177_v22 }
  0x66   :  { %385 = vrcp.f32 %v332_v13  ;;  %v344_v19 = vand.u32 2147483648, %v332_v13  ;;  %vm338_vm5 = vweird.f32 %v332_v13  ;;  %v342_v21 = vand.u32 2147483647, %v332_v13 }
  0x68   :  { %v345_v24 = vor.u32 1.1754944e-38, %v344_v19  ;;  %vm343_vm8 = vcmp.eq.f32.partialorder %v342_v21, 8.507059e+37 }
  0x6c   :  { %v386_v15 = vpop.eup %385 }
  0x6d   :  { %v334_v16 = vmul.f32 %v386_v15, %v332_v13  ;;  %vm339_vm6 = vweird.f32 %v386_v15 }
  0x6e   :  { %vm340_vm7 = vmor %vm338_vm5, %vm339_vm6 }
  0x6f   :  { %v335_v20 = vsub.f32 1.0, %v334_v16 }
  0x71   :  { %v336_v23 = vmul.f32 %v386_v15, %v335_v20 }
  0x73   :  { %v337_v26 = vadd.f32 %v386_v15, %v336_v23 }
  0x75   :  { %v341_v29 = vsel %vm340_vm7, %v386_v15, %v337_v26 }
  0x76   :  { %v346_v30 = vsel %vm343_vm8, %v345_v24, %v341_v29 }
  0x77   :  { %v347_v31 = vmul.f32 %v346_v30, %v178_v27 }
  0x79   :  { %352 = vst.msk [vmem:[#allocation5] sm:$0xf] %vm350_vm9, %v347_v31 }
  0x7a   :  { %363 = dma.vmem_to_hbm [thread:$0]  %s359_s11, 64, %s361_s14, [#allocation4]  }
  0x7b   :  { %437 = dma.done.wait [#allocation4], 64  }
  0x7c   :  { %438 = vsyncadd [#allocation4], 4294967232 }
  0x7d   :  { %368 = vsyncpa [#allocation3], 1 }
  0x7e   :  { %369 = vsyncpa [#allocation4], 1 }

</bundles_post_ra>
